<compile_context>
chip_gen: v5e
topology: v5e:2x2
jax: 0.10.0
libtpu: 0.0.40
codegen_flags: <defaults>
</compile_context>

<pallas_src>
import jax
import jax.numpy as jnp
from jax import lax
from jax.experimental import pallas as pl
from jax.experimental.pallas import tpu as pltpu


def _make_mrl_kernel(B, N, tn, num_blocks, b_fold):
    """Build the per-block kernel. All sizing args are Python ints."""
    full_chunks = tn // 128
    rem_lanes = N - (num_blocks - 1) * tn  # valid lanes in the last block

    def fold_block(pos, neg_ref, n_full, ragged):
        """Chunked fused fold of relu(neg - pos) into a (B, 128) f32 acc."""
        acc = jnp.zeros((B, 128), jnp.float32)
        if n_full > 0:
            def body(c, a):
                start = pl.multiple_of(c * 128, 128)
                chunk = neg_ref[:, pl.ds(start, 128)].astype(jnp.float32)
                return a + jnp.maximum(chunk - pos, 0.0)
            acc = lax.fori_loop(0, n_full, body, acc,
                                unroll=min(8, n_full))
        if ragged:
            # Single ragged 128-lane chunk: mask is a compile-time constant.
            start = n_full * 128
            chunk = neg_ref[:, start:start + 128].astype(jnp.float32)
            v = jnp.maximum(chunk - pos, 0.0)
            lane = lax.broadcasted_iota(jnp.int32, (B, 128), 1)
            acc = acc + jnp.where(lane < ragged, v, 0.0)
        return acc

    def fold_sublanes(acc):
        """Fold (B, 128) -> (b_fold, 128) with VPU adds (static slices)."""
        if b_fold == B:
            return acc
        part = acc[0:8, :]
        for g in range(1, B // 8):
            part = part + acc[g * 8:(g + 1) * 8, :]
        return part

    def kernel(pos_ref, neg_ref, out_ref):
        pos = pos_ref[...]  # (B, 128) f32, already includes -gamma
        if rem_lanes == tn:
            # N divides evenly into blocks: no masking anywhere.
            out_ref[...] = fold_sublanes(
                fold_block(pos, neg_ref, full_chunks, 0))
        else:
            j = pl.program_id(0)

            @pl.when(j < num_blocks - 1)
            def _():
                out_ref[...] = fold_sublanes(
                    fold_block(pos, neg_ref, full_chunks, 0))

            @pl.when(j == num_blocks - 1)
            def _():
                out_ref[...] = fold_sublanes(
                    fold_block(pos, neg_ref,
                               rem_lanes // 128, rem_lanes % 128))

    return kernel


def mrl_loss(gamma: float, pos: jax.Array, neg: jax.Array) -> jax.Array:
    """Pallas implementation of MRL(gamma).forward(pos, neg)."""
    (B,) = pos.shape
    B2, N = neg.shape
    assert B2 == B, "batch mismatch between positive and negative scores"

    # --- per-generation VMEM / block budget --------------------------------
    try:
        vmem_cap = int(pltpu.get_tpu_info().vmem_capacity_bytes)
    except Exception:
        vmem_cap = 64 * 1024 * 1024  # conservative (valid on v7x too)
    vmem_limit = int(min(vmem_cap // 2, 64 * 1024 * 1024))
    max_block_bytes = vmem_limit // 4  # double-buffered neg uses <= limit/2

    # --- lane-tile selection -------------------------------------------------
    itemsize = jnp.dtype(neg.dtype).itemsize
    per_lane_bytes = max(1, B * itemsize)
    budget_tn = max(128, (max_block_bytes // per_lane_bytes) // 128 * 128)
    n128 = pl.cdiv(N, 128) * 128
    tn = min(budget_tn, n128)
    if n128 >= 256:
        # Keep at least 2 grid steps so the "parallel" axis can split across
        # both v7x TensorCores (negligible cost on single-TC chips).
        half = max(128, pl.cdiv(pl.cdiv(N, 2), 128) * 128)
        tn = min(tn, half)
    tn = int(tn)
    num_blocks = int(pl.cdiv(N, tn))

    # Sublane fold only for clean multiples of 8 (otherwise emit (B,128)).
    b_fold = 8 if (B > 8 and B % 8 == 0) else B

    # --- host-side prep (tiny) ----------------------------------------------
    # Fold gamma into pos and pre-broadcast to a lane-dense (B, 128) tile.
    pos_g = jnp.broadcast_to(
        (pos.astype(jnp.float32) - jnp.float32(gamma))[:, None], (B, 128))

    kernel = _make_mrl_kernel(B, N, tn, num_blocks, b_fold)

    partials = pl.pallas_call(
        kernel,
        out_shape=jax.ShapeDtypeStruct((num_blocks, b_fold, 128), jnp.float32),
        grid_spec=pltpu.PrefetchScalarGridSpec(
            num_scalar_prefetch=0,
            grid=(num_blocks,),
            in_specs=[
                # pos_g: same (full) lane-dense tile every step.
                pl.BlockSpec((B, 128), lambda j: (0, 0)),
                # neg: large lane-dense tile over the N axis, full extent in B
                # (no host-side padding / copy of neg).
                pl.BlockSpec((B, tn), lambda j: (0, j)),
            ],
            # Each program owns one (b_fold, 128) lane-dense partial-sum slab.
            out_specs=pl.BlockSpec((None, b_fold, 128), lambda j: (j, 0, 0)),
        ),
        compiler_params=pltpu.CompilerParams(
            dimension_semantics=("parallel",),
            vmem_limit_bytes=vmem_limit,
        ),
    )(pos_g, neg)

    # Final tiny reduction + mean in plain JAX (masked tails contribute 0).
    return jnp.sum(partials) / jnp.float32(B * N)


if __name__ == "__main__":
    key = jax.random.PRNGKey(0)
    k1, k2, k3, k4, k5, k6 = jax.random.split(key, 6)

    gamma = 1.0  # deterministic "parameter" matching MRL(gamma)

    # Case 1: aligned shapes (N multiple of 128, B multiple of 8).
    B, N = 8, 256
    pos = jax.random.normal(k1, (B,), dtype=jnp.float32)
    neg = jax.random.normal(k2, (B, N), dtype=jnp.float32)
    loss = jax.block_until_ready(mrl_loss(gamma, pos, neg))
    ref = jnp.mean(jnp.maximum(gamma - pos[:, None] + neg, 0.0))
    if not jnp.allclose(loss, ref, rtol=1e-5, atol=1e-6):
        raise AssertionError(f"mismatch (aligned): kernel={loss} ref={ref}")

    # Case 2: unaligned shapes (ragged B and ragged N tail, no host copy).
    B2, N2 = 5, 200
    pos2 = jax.random.normal(k3, (B2,), dtype=jnp.float32)
    neg2 = jax.random.normal(k4, (B2, N2), dtype=jnp.float32)
    loss2 = jax.block_until_ready(mrl_loss(gamma, pos2, neg2))
    ref2 = jnp.mean(jnp.maximum(gamma - pos2[:, None] + neg2, 0.0))
    if not jnp.allclose(loss2, ref2, rtol=1e-5, atol=1e-6):
        raise AssertionError(f"mismatch (padded): kernel={loss2} ref={ref2}")

    # Case 3: multi-chunk block + ragged last block (exercises fori fold).
    B3, N3 = 8, 1000
    pos3 = jax.random.normal(k5, (B3,), dtype=jnp.float32)
    neg3 = jax.random.normal(k6, (B3, N3), dtype=jnp.float32)
    loss3 = jax.block_until_ready(mrl_loss(gamma, pos3, neg3))
    ref3 = jnp.mean(jnp.maximum(gamma - pos3[:, None] + neg3, 0.0))
    if not jnp.allclose(loss3, ref3, rtol=1e-5, atol=1e-6):
        raise AssertionError(f"mismatch (multi-chunk): kernel={loss3} ref={ref3}")

    print("KERNEL_OK")
</pallas_src>

<mosaic_0001>
module attributes {stable_mosaic.version = 11 : i64} {
  func.func @kernel(%arg0: i32, %arg1: memref<8x128xf32, #tpu.memory_space<vmem>>, %arg2: memref<8x128xf32, #tpu.memory_space<vmem>>, %arg3: memref<1x8x128xf32, #tpu.memory_space<vmem>>) attributes {dimension_semantics = [#tpu.dimension_semantics<parallel>], iteration_bounds = array<i64: 2>, scalar_prefetch = 0 : i64, scratch_operands = 0 : i64, tpu.core_type = #tpu.core_type<tc>, window_params = [{pipeline_mode = #tpu.pipeline_mode<synchronous>, transform_indices = @transform_0, window_bounds = array<i64: 8, 128>}, {transform_indices = @transform_1, window_bounds = array<i64: 8, 128>}, {transform_indices = @transform_2, window_bounds = array<i64: 1, 8, 128>}]} {
    %c0 = arith.constant 0 : index
    %c0_0 = arith.constant 0 : index
    %0 = vector.load %arg1[%c0, %c0_0] : memref<8x128xf32, #tpu.memory_space<vmem>>, vector<8x128xf32>
    %cst = arith.constant 0.000000e+00 : f32
    %1 = vector.broadcast %cst : f32 to vector<8x128xf32>
    %c0_i32 = arith.constant 0 : i32
    %c128_i32 = arith.constant 128 : i32
    %2 = arith.muli %c0_i32, %c128_i32 : i32
    %3 = tpu.assume_multiple %2, 128 : i32
    %c0_1 = arith.constant 0 : index
    %4 = arith.index_cast %3 : i32 to index
    %5 = vector.load %arg2[%c0_1, %4] : memref<8x128xf32, #tpu.memory_space<vmem>>, vector<8x128xf32>
    %6 = arith.subf %5, %0 : vector<8x128xf32>
    %cst_2 = arith.constant 0.000000e+00 : f32
    %7 = vector.broadcast %cst_2 : f32 to vector<8x128xf32>
    %8 = arith.maximumf %6, %7 : vector<8x128xf32>
    %9 = arith.addf %1, %8 : vector<8x128xf32>
    %c1_i32 = arith.constant 1 : i32
    %c0_3 = arith.constant 0 : index
    %c0_4 = arith.constant 0 : index
    %c0_5 = arith.constant 0 : index
    %10 = vector.load %arg3[%c0_3, %c0_4, %c0_5] : memref<1x8x128xf32, #tpu.memory_space<vmem>>, vector<1x8x128xf32>
    %11 = vector.shape_cast %10 : vector<1x8x128xf32> to vector<8x128xf32>
    %12 = vector.shape_cast %9 : vector<8x128xf32> to vector<1x8x128xf32>
    tpu.vector_store %arg3[%c0_3, %c0_4, %c0_5], %12 {strides = array<i32>} : memref<1x8x128xf32, #tpu.memory_space<vmem>>, vector<1x8x128xf32>,
    return
  }
  func.func @transform_0(%arg0: i32) -> (i32, i32) {
    %c0_i32 = arith.constant 0 : i32
    %c0_i32_0 = arith.constant 0 : i32
    %c0_i32_1 = arith.constant 0 : i32
    return %c0_i32, %c0_i32_0 : i32, i32
  }
  func.func @transform_1(%arg0: i32) -> (i32, i32) {
    %c0_i32 = arith.constant 0 : i32
    %c0_i32_0 = arith.constant 0 : i32
    return %c0_i32, %arg0 : i32, i32
  }
  func.func @transform_2(%arg0: i32) -> (i32, i32, i32) {
    %c0_i32 = arith.constant 0 : i32
    %c0_i32_0 = arith.constant 0 : i32
    %c0_i32_1 = arith.constant 0 : i32
    return %arg0, %c0_i32, %c0_i32_0 : i32, i32, i32
  }
}

</mosaic_0001>

<bundles_post_ra>
// kernel: tpu_custom_call.1
= control target key start
LH: loop header
LB: loop body
LE: loop exit
PB: predicated region body
PF: predicated region fallthrough
CT: control target
= control target key end

     0   :  { %7 = vsyncpa [#allocation3], 0  ;;  %s637_s0 = inlined_call_operand.hbm [shape: f32[8,128], index: 0, kind: input, shape index: {}]   ;;  %s638_s1 = inlined_call_operand.hbm [shape: f32[8,256], index: 1, kind: input, shape index: {}]   ;;  %s639_s2 = inlined_call_operand.hbm [shape: f32[2,8,128], index: 2, kind: output, shape index: {}]  }
   0x1   :  { %8 = vsyncpa [#allocation6], 0 }
   0x2   :  { %10 = vsyncpa [#allocation6 + $0x1], 0 }
   0x3   :  { %11 = vsyncpa [#allocation4], 0 }
   0x4   :  { %13 = vsyncpa [#allocation4 + $0x1], 0  ;;  %s499_s9 = smov 0   ;;  %s501_s10 = smov 0  }
   0x5   :  { %s503_s11 = smov 0   ;;  %s505_s12 = smov 0  }
   0x6 LB: > { %s520_s13 = sadd.s32 4294967295, %s481_s12   ;;  %s280_s14 = sadd.s32 4294967294, %s481_s12   ;;  %s481_s12 = sphi %s505_s12, %s649_s12   ;;  %s477_s11 = sphi %s503_s11, %s648_s11   ;;  %s473_s10 = sphi %s501_s10, %s647_s10   ;;  %s469_s9 = sphi %s499_s9, %s646_s9  }
   0x7   : > { %p60_p0 = scmp.ne.s32.totalorder %s473_s10, %s469_s9  ;;  %p61_p1 = scmp.eq.s32.totalorder %s520_s13, 0 }
   0x8   : > { %p84_p2 = scmp.eq.s32.totalorder %s520_s13, 1  ;;  %p90_p3 = scmp.eq.s32.totalorder %s280_s14, 1 }
   0x9   : > { %p529_p4 = por %p61_p1, %p60_p0  ;;  %p281_p5 = scmp.ge.s32.totalorder %s481_s12, 1 }
   0xa   : > { %p534_p6 = por %p90_p3, %p60_p0  ;;  %p97_p7 = scmp.lt.s32.totalorder %s481_s12, 3 }
   0xb   : > { %s109_s19 = sshll.u32 %s637_s0, 4  ;;  %s483_s21 = smov [#allocation2]   ;;  %s110_s19 = int_to_ptr.hbm [resolvable:$true] %s109_s19 }
   0xc   : > { %p542_p8 = pnand %p281_p5, %p97_p7  ;;  %s111_s22 = sshll.u32 %s483_s21, 4  ;;  %s112_s22 = int_to_ptr.vmem [resolvable:$true] %s111_s22 }
   0xd   : > { %s552_s23 = sadd.s32 1, %s481_s12   ;;  %s47_s24 = sadd.s32 1, %s477_s11 }
   0xe   : > { %p302_p10 = pneg %p542_p8  ;;  %s44_s25 = ssub.s32 %s481_s12, %s552_s23 }
   0xf   : > { %p45_p12 = scmp.eq.s32.totalorder %s44_s25, 0  ;;  %p54_p13 = scmp.ne.s32.totalorder %s477_s11, %s473_s10 }
  0x10   : > { %p303_p11 = pnand %p302_p10, %p61_p1  ;;  %p55_p0 = scmp.eq.s32.totalorder %s481_s12, 0 }
  0x11   : > { %s561_s26 = scalar_select %p45_p12, %s477_s11, %s47_s24  }
  0x12   : > { %305 = dma.hbm_to_vmem [thread:$0]  (!%p303_p11), %s110_s19, 128, %s112_s22, [#allocation3]  }
  0x13   : > { %p565_p3 = por %p84_p2, %p54_p13  ;;  %p315_p5 = scmp.lt.s32.totalorder %s481_s12, 2 }
  0x14   : > { %s122_s28 = sand.u32 1, %s477_s11   ;;  %s285_s29 = sshll.u32 %s481_s12, 3 }
  0x15   : > { %p56_p7 = por %p55_p0, %p54_p13  ;;  %s284_s30 = sshll.u32 %s122_s28, 3 }
  0x16   : > { %s130_s5 = scalar_lea.hbm %s638_s1, %s285_s29  ;;  %s126_s7 = scalar_lea.vmem [#allocation5], %s284_s30 }
  0x17   : > { %s132_s6 = sshll.u32 %s130_s5, 4  ;;  %s134_s8 = sshll.u32 %s126_s7, 4  ;;  %s133_s6 = int_to_ptr.hbm [resolvable:$true] %s132_s6  ;;  %s135_s8 = int_to_ptr.vmem [resolvable:$true] %s134_s8 }
  0x18   : > { %p575_p10 = pnand %p315_p5, %p56_p7  ;;  %s123_s17 = scalar_lea.sflag [#allocation6], %s122_s28 }
  0x19   : > { %s381_s18 = sshra.s32 %s133_s6, 4  ;;  %s388_s24 = scalar_lea.hbm %s638_s1, 16  ;;  %s382_s18 = int_to_ptr.hbm [resolvable:$true] %s381_s18 }
  0x1a   : > { %s383_s19 = scalar_lea.hbm %s382_s18, 8  ;;  %p385_p11 = pneg %p575_p10 }
  0x1b   : > { %p384_p2 = scmp.ne.s32.totalorder %s382_s18, %s383_s19  ;;  %p389_p0 = scmp.lt.s32.totalorder %s382_s18, %s638_s1 }
  0x1c   : > { %p390_p5 = scmp.lt.s32.totalorder %s388_s24, %s383_s19 }
  0x1d   : > { %p386_p12 = pnand %p385_p11, %p384_p2 }
  0x1e   : > { %p391_p7 = por %p390_p5, %p389_p0 }
  0x1f   : > { %p387_p13 = pneg %p386_p12 }
  0x21   : > { %p392_p9 = pnand %p391_p7, %p387_p13 }
  0x23   : > { %395 = shalt.err (!%p392_p9)
}
  0x24   : > { %309 = dma.hbm_to_vmem [thread:$0]  (!%p575_p10), %s133_s6, 128, %s135_s8, %s123_s17  }
  0x25   : > { %143 = sbr.rel (%p542_p8) target bundleno = 62 (0x3e), region = 28 }
  0x2a   : > { %456 = dma.done.wait (%p61_p1), [#allocation3], 128  }
  0x2b   : > { %458 = vsyncadd (%p61_p1), [#allocation3], 4294967168  ;;  %s596_s28 = sand.u32 1, %s473_s10  }
  0x2c   : > { %s288_s30 = sshll.u32 %s596_s28, 3  ;;  %s151_s3 = scalar_lea.sflag [#allocation6], %s596_s28 }
  0x2d   : > { %s154_s4 = scalar_lea.vmem [#allocation5], %s288_s30 }
  0x2e   : > { %460 = dma.done.wait (%p529_p4), %s151_s3, 128  }
  0x2f   : > { %462 = vsyncadd (%p529_p4), %s151_s3, 4294967168  ;;  %s291_s20 = sshll.u32 %s520_s13, 3  ;;  %v176_v0 = vld [vmem:[#allocation2] sm:$0xff]  ;;  %v177_v1 = vld [vmem:[%s154_s4] sm:$0xff]  ;;  %s175_s8 = scalar_lea.vmem [#allocation7], %s288_s30 }
  0x30   : > { %s193_s7 = scalar_lea.hbm %s639_s2, %s291_s20  ;;  %s195_s14 = sshll.u32 %s175_s8, 4  ;;  %v178_v2 = vsub.f32 %v177_v1, %v176_v0  ;;  %s196_s14 = int_to_ptr.vmem [resolvable:$true] %s195_s14 }
  0x31   : > { %s197_s17 = sshll.u32 %s193_s7, 4  ;;  %s183_s15 = scalar_lea.sflag [#allocation4], %s596_s28  ;;  %s198_s17 = int_to_ptr.hbm [resolvable:$true] %s197_s17 }
  0x32   : > { %v179_v3 = vmax.f32 %v178_v2, 0.0  ;;  %s425_s18 = sshra.s32 %s198_s17, 4  ;;  %s431_s22 = scalar_lea.hbm %s639_s2, 16  ;;  %s426_s18 = int_to_ptr.hbm [resolvable:$true] %s425_s18 }
  0x33   : > { %s427_s19 = scalar_lea.hbm %s426_s18, 8  ;;  %p432_p9 = scmp.lt.s32.totalorder %s426_s18, %s639_s2 }
  0x34   : > { %181 = vst [vmem:[%s175_s8] sm:$0xff] %v179_v3  ;;  %p428_p1 = scmp.ne.s32.totalorder %s426_s18, %s427_s19  ;;  %p433_p10 = scmp.lt.s32.totalorder %s431_s22, %s427_s19 }
  0x36   : > { %p429_p4 = pnand %p428_p1, %p565_p3  ;;  %p434_p2 = por %p433_p10, %p432_p9 }
  0x38   : > { %p430_p8 = pneg %p429_p4 }
  0x3a   : > { %p435_p11 = pnand %p434_p2, %p430_p8 }
  0x3c   : > { %438 = shalt.err (!%p435_p11)
}
  0x3d   : > { %300 = dma.vmem_to_hbm [thread:$0]  (%p565_p3), %s196_s14, 128, %s198_s17, %s183_s15  }
  0x3e PF: > { %s209_s29 = sand.u32 1, %s469_s9   ;;  %p645_p12 = scmp.ge.s32.totalorder %s481_s12, 2 }
  0x3f   : > { %s210_s28 = scalar_lea.sflag [#allocation4], %s209_s29 }
  0x40   : > { %p311_p13 = pnand %p645_p12, %p534_p6 }
  0x42   : > { %p312_p0 = pneg %p311_p13 }
  0x44   : > { %464 = dma.done.wait (%p312_p0), %s210_s28, 128  }
  0x45   : > { %466 = vsyncadd (%p312_p0), %s210_s28, 4294967168  ;;  %p16_p5 = scmp.ge.s32.totalorder %s552_s23, 4   ;;  %s646_s9 = smov %s473_s10 }
  0x46   : > { %s647_s10 = smov %s477_s11  ;;  %s648_s11 = smov %s561_s26 }
  0x47   : > { %s649_s12 = smov %s552_s23  ;;  %18 = sbr.rel (!%p16_p5) target bundleno = 6 (0x6), region = 78 }
  0x4c   :  { %216 = vsyncpa [#allocation3], 1 }
  0x4d   :  { %218 = vsyncpa [#allocation3 + $0x1], 1 }
  0x4e   :  { %219 = vsyncpa [#allocation6], 1 }
  0x4f   :  { %221 = vsyncpa [#allocation6 + $0x1], 1 }
  0x50   :  { %222 = vsyncpa [#allocation4], 1 }
  0x51   :  { %224 = vsyncpa [#allocation4 + $0x1], 1 }

</bundles_post_ra>
